<compile_context>
chip_gen: v6e
topology: v6e:2x2x1
jax: 0.10.0
libtpu: 0.0.40
codegen_flags: <defaults>
</compile_context>

<pallas_src>
import functools

import jax
import jax.numpy as jnp
import numpy as np
from jax import lax
from jax.experimental import pallas as pl
from jax.experimental.pallas import tpu as pltpu


_VMEM_LIMIT_BYTES = 48 * 1024 * 1024  # safe on v5e/v6e (128 MiB) and v7x (64 MiB)


def _round_up(x, m):
    return ((x + m - 1) // m) * m


def _choose_tile_m(m, outer=1, target=512):
    """Row tile: multiple of 16 (bf16 packing), <= target, and split so the total
    grid has >= 2 steps when possible (2 TensorCores on v7x)."""
    tm = min(target, _round_up(m, 16))
    steps = (m + tm - 1) // tm
    if outer * steps < 2 and m > 16:
        tm = _round_up((m + 1) // 2, 16)
    return tm


# ---------------------------------------------------------------------------
# Kernel 1: stage a  (Tx1x1 conv + BN + ReLU), im2col-free.
#   The padded temporal frame (per n) stays resident in VMEM; each temporal tap
#   is a pl.ds row-window at offset k*H*W, matmul'd and accumulated in f32.
# ---------------------------------------------------------------------------
def _conv_a_kernel(x_ref, w_ref, b_ref, o_ref, *, temp_k, row_stride, tile_m):
    i = pl.program_id(1)
    base = pl.multiple_of(i * tile_m, tile_m)
    acc = None
    for k in range(temp_k):
        xt = x_ref[0, pl.ds(base + k * row_stride, tile_m), :]      # (tile_m, Cin)
        prod = jnp.dot(xt, w_ref[k], preferred_element_type=jnp.float32)
        acc = prod if acc is None else acc + prod
    y = jnp.maximum(acc + b_ref[...], 0.0)
    o_ref[0] = y.astype(o_ref.dtype)


def conv_temporal_bn_relu(x_nthwc, w_a, bias_a, *, temp_k, out_dtype=jnp.bfloat16):
    """x: (N, T, H, W, Cin) bf16 (already spatially strided for stride_1x1),
    w_a: (temp_k, Cin, Ci) bf16 with BN scale folded, bias_a: (Ci,) f32."""
    N, T, H, W, Cin = x_nthwc.shape
    Ci = w_a.shape[2]
    pad_t = temp_k // 2
    T_out = T + 2 * pad_t - temp_k + 1
    HW = H * W
    M = T_out * HW
    tm = _choose_tile_m(M, outer=N)
    Mp = _round_up(M, tm)
    delta_max = (temp_k - 1) * HW
    F = Mp + delta_max

    xp = jnp.pad(x_nthwc, ((0, 0), (pad_t, pad_t), (0, 0), (0, 0), (0, 0)))
    frames = xp.reshape(N, (T + 2 * pad_t) * HW, Cin)
    have = frames.shape[1]
    if F > have:
        frames = jnp.pad(frames, ((0, 0), (0, F - have), (0, 0)))
    elif F < have:
        frames = frames[:, :F, :]
    bias2 = bias_a.reshape(1, Ci).astype(jnp.float32)

    flops = 2 * N * Mp * temp_k * Cin * Ci
    bytes_accessed = int(frames.size * frames.dtype.itemsize
                         + w_a.size * w_a.dtype.itemsize + bias2.size * 4
                         + N * Mp * Ci * np.dtype(out_dtype).itemsize)

    out = pl.pallas_call(
        functools.partial(_conv_a_kernel, temp_k=temp_k, row_stride=HW, tile_m=tm),
        out_shape=jax.ShapeDtypeStruct((N, Mp, Ci), out_dtype),
        grid_spec=pltpu.PrefetchScalarGridSpec(
            num_scalar_prefetch=0,
            grid=(N, Mp // tm),
            in_specs=[
                pl.BlockSpec((1, F, Cin), lambda n, i: (n, 0, 0)),       # resident frame
                pl.BlockSpec((temp_k, Cin, Ci), lambda n, i: (0, 0, 0)),  # invariant weights
                pl.BlockSpec((1, Ci), lambda n, i: (0, 0)),
            ],
            out_specs=pl.BlockSpec((1, tm, Ci), lambda n, i: (n, i, 0)),
        ),
        compiler_params=pltpu.CompilerParams(
            dimension_semantics=("parallel", "parallel"),
            vmem_limit_bytes=_VMEM_LIMIT_BYTES),
        cost_estimate=pl.CostEstimate(flops=flops, transcendentals=0,
                                      bytes_accessed=bytes_accessed),
    )(frames, w_a, bias2)
    return out[:, :M, :].reshape(N, T_out, H, W, Ci)


# ---------------------------------------------------------------------------
# Kernel 2 (fused stages b + c), im2col-free:
#   per group g:  h_g = relu( sum_t frame[tap_t, g-chans] @ wb[t, g] + bias_b_g )
#                 y  += h_g @ wc[g-rows]
#   y = y + bias_c.   The frame is one (n,t) phase-split image resident in VMEM;
#   each tap is a static contiguous row window (offsets handle stride/dilation).
# ---------------------------------------------------------------------------
def _fused_bc_kernel(x_ref, wb_ref, bb_ref, wc_ref, bc_ref, o_ref,
                     *, tap_offsets, m_out, g_k, cpg):
    y = None
    for g in range(g_k):
        c0 = g * cpg
        acc = None
        for t, off in enumerate(tap_offsets):
            xt = x_ref[0, off:off + m_out, c0:c0 + cpg]              # (m_out, cpg) bf16
            prod = jnp.dot(xt, wb_ref[t, g], preferred_element_type=jnp.float32)
            acc = prod if acc is None else acc + prod
        h = jnp.maximum(acc + bb_ref[:, c0:c0 + cpg], 0.0)           # (m_out, cpg) f32
        yg = jnp.dot(h.astype(wc_ref.dtype), wc_ref[c0:c0 + cpg, :],
                     preferred_element_type=jnp.float32)
        y = yg if y is None else y + yg
    o_ref[0] = (y + bc_ref[...]).astype(o_ref.dtype)


def fused_3x3_grouped_1x1(frames, wb_k, bias_b, wc, bias_c, *,
                          tap_offsets, m_out, g_k, cpg, out_dtype):
    """frames: (NT, P*F, Ci) bf16; wb_k: (9, g_k, cpg, cpg) bf16 (BN folded);
    wc: (Ci, Cout) bf16 (BN folded); biases f32."""
    NT, PF, Ci = frames.shape
    Cout = wc.shape[1]
    bb2 = bias_b.reshape(1, Ci).astype(jnp.float32)
    bc2 = bias_c.reshape(1, Cout).astype(jnp.float32)

    flops = 2 * NT * m_out * (9 * g_k * cpg * cpg + Ci * Cout)
    bytes_accessed = int(frames.size * frames.dtype.itemsize
                         + wb_k.size * wb_k.dtype.itemsize
                         + wc.size * wc.dtype.itemsize
                         + (bb2.size + bc2.size) * 4
                         + NT * m_out * Cout * np.dtype(out_dtype).itemsize)

    return pl.pallas_call(
        functools.partial(_fused_bc_kernel, tap_offsets=tuple(tap_offsets),
                          m_out=m_out, g_k=g_k, cpg=cpg),
        out_shape=jax.ShapeDtypeStruct((NT, m_out, Cout), out_dtype),
        grid_spec=pltpu.PrefetchScalarGridSpec(
            num_scalar_prefetch=0,
            grid=(NT,),
            in_specs=[
                pl.BlockSpec((1, PF, Ci), lambda i: (i, 0, 0)),           # one (n,t) frame
                pl.BlockSpec((9, g_k, cpg, cpg), lambda i: (0, 0, 0, 0)),  # invariant weights
                pl.BlockSpec((1, Ci), lambda i: (0, 0)),
                pl.BlockSpec((Ci, Cout), lambda i: (0, 0)),
                pl.BlockSpec((1, Cout), lambda i: (0, 0)),
            ],
            out_specs=pl.BlockSpec((1, m_out, Cout), lambda i: (i, 0, 0)),
        ),
        compiler_params=pltpu.CompilerParams(
            dimension_semantics=("parallel",),
            vmem_limit_bytes=_VMEM_LIMIT_BYTES),
        cost_estimate=pl.CostEstimate(flops=flops, transcendentals=0,
                                      bytes_accessed=bytes_accessed),
    )(frames, wb_k, bb2, wc, bc2)


# ---------------------------------------------------------------------------
# Parameter init (deterministic, shapes match the PyTorch module's __init__)
# ---------------------------------------------------------------------------
def init_params(key, dim_in, dim_out, temp_k, dim_inner, num_groups):
    keys = jax.random.split(key, 15)
    p = {}
    p["a_w"] = 0.1 * jax.random.normal(
        keys[0], (dim_inner, dim_in, temp_k, 1, 1), jnp.float32)
    p["b_w"] = 0.1 * jax.random.normal(
        keys[1], (dim_inner, dim_inner // num_groups, 1, 3, 3), jnp.float32)
    p["c_w"] = 0.1 * jax.random.normal(
        keys[2], (dim_out, dim_inner, 1, 1, 1), jnp.float32)
    for i, (name, dim) in enumerate((("a", dim_inner),
                                     ("b", dim_inner),
                                     ("c", dim_out))):
        k0, k1, k2, k3 = keys[3 + 4 * i: 7 + 4 * i]
        p[f"{name}_gamma"] = 1.0 + 0.1 * jax.random.normal(k0, (dim,), jnp.float32)
        p[f"{name}_beta"] = 0.1 * jax.random.normal(k1, (dim,), jnp.float32)
        p[f"{name}_mean"] = 0.1 * jax.random.normal(k2, (dim,), jnp.float32)
        p[f"{name}_var"] = 0.5 + jax.random.uniform(k3, (dim,), jnp.float32)
    return p


def _fold_bn(gamma, beta, mean, var, eps):
    scale = gamma / jnp.sqrt(var + eps)
    bias = beta - mean * scale
    return scale, bias


# ---------------------------------------------------------------------------
# Forward pass (wrapper glue = pad / phase-split / reshape; compute = Pallas)
# ---------------------------------------------------------------------------
def bottleneck_transform_forward(x_ncdhw, p, *, temp_k, stride, num_groups,
                                 stride_1x1=False, dilation=1, eps=1e-5,
                                 out_dtype=jnp.float32):
    str1, str3 = (stride, 1) if stride_1x1 else (1, stride)
    x = jnp.transpose(x_ncdhw, (0, 2, 3, 4, 1)).astype(jnp.bfloat16)   # NTHWC
    N = x.shape[0]
    dim_inner = p["a_w"].shape[0]
    dim_out = p["c_w"].shape[0]

    scale_a, bias_a = _fold_bn(p["a_gamma"], p["a_beta"], p["a_mean"], p["a_var"], eps)
    scale_b, bias_b = _fold_bn(p["b_gamma"], p["b_beta"], p["b_mean"], p["b_var"], eps)
    scale_c, bias_c = _fold_bn(p["c_gamma"], p["c_beta"], p["c_mean"], p["c_var"], eps)

    # ---- stage a: Tx1x1 conv (spatial stride str1) + BN + ReLU -------------
    xs = x[:, :, ::str1, ::str1, :]
    w_a = jnp.transpose(p["a_w"][:, :, :, 0, 0], (2, 1, 0))            # (tk, Cin, Ci)
    w_a = (w_a * scale_a[None, None, :]).astype(jnp.bfloat16)
    ya = conv_temporal_bn_relu(xs, w_a, bias_a, temp_k=temp_k)         # (N,T2,H1,W1,Ci) bf16

    # ---- stages b + c (fused): 1x3x3 grouped + BN + ReLU, 1x1x1 + BN -------
    _, T2, H1, W1, Ci = ya.shape
    s, d = str3, dilation
    H2 = (H1 - 1) // s + 1
    W2 = (W1 - 1) // s + 1
    Hp, Wp = H1 + 2 * d, W1 + 2 * d
    Hpp, Wpp = _round_up(Hp, s), _round_up(Wp, s)
    Hq, Wq = Hpp // s, Wpp // s

    # pad + space-to-depth phase split (one ~1.1x copy; replaces the 2.25x-9x im2col)
    ya_pad = jnp.pad(ya, ((0, 0), (0, 0), (d, Hpp - H1 - d), (d, Wpp - W1 - d), (0, 0)))
    yp = ya_pad.reshape(N, T2, Hq, s, Wq, s, Ci)
    yp = jnp.transpose(yp, (0, 1, 3, 5, 2, 4, 6)).reshape(N * T2, s * s, Hq * Wq, Ci)

    m_out = H2 * Wq                          # Wq >= W2 columns computed, extras dropped
    off_max = (2 * d) // s
    F = m_out + off_max * Wq + off_max       # per-phase frame rows needed
    if F > Hq * Wq:
        yp = jnp.pad(yp, ((0, 0), (0, 0), (0, F - Hq * Wq), (0, 0)))
    else:
        yp = yp[:, :, :F, :]
    frames = yp.reshape(N * T2, s * s * F, Ci)

    tap_offsets = []
    for kh in range(3):
        for kw in range(3):
            ph, pw = (kh * d) % s, (kw * d) % s
            oh, ow = (kh * d) // s, (kw * d) // s
            tap_offsets.append((ph * s + pw) * F + oh * Wq + ow)

    # grouped-conv weights (BN scale folded into output channels)
    cpg = dim_inner // num_groups
    wbt = jnp.transpose(p["b_w"][:, :, 0, :, :], (2, 3, 1, 0))         # (3,3,cpg,Ci)
    wbt = wbt * scale_b[None, None, None, :]
    use_groups = num_groups > 1 and cpg % 128 == 0
    if use_groups:
        g_k, cq = num_groups, cpg
        wb_k = wbt.reshape(3, 3, cpg, num_groups, cpg)
        wb_k = jnp.transpose(wb_k, (0, 1, 3, 2, 4)).reshape(9, num_groups, cpg, cpg)
    else:
        # TODO(synk): small groups (cpg < 128) fall back to an exact block-diagonal
        #             dense weight; per-group compute there would underfill MXU lanes.
        g_k, cq = 1, dim_inner
        dense = jnp.zeros((3, 3, dim_inner, dim_inner), jnp.float32)
        for g in range(num_groups):
            sl = slice(g * cpg, (g + 1) * cpg)
            dense = dense.at[:, :, sl, sl].set(wbt[:, :, :, sl])
        wb_k = dense.reshape(9, 1, dim_inner, dim_inner)

    wc = jnp.transpose(p["c_w"][:, :, 0, 0, 0], (1, 0)) * scale_c[None, :]

    yc = fused_3x3_grouped_1x1(
        frames, wb_k.astype(jnp.bfloat16), bias_b,
        wc.astype(jnp.bfloat16), bias_c,
        tap_offsets=tap_offsets, m_out=m_out, g_k=g_k, cpg=cq,
        out_dtype=out_dtype)                                           # (NT, m_out, Cout)

    yc = yc.reshape(N, T2, H2, Wq, dim_out)[:, :, :, :W2, :]
    return jnp.transpose(yc, (0, 4, 1, 2, 3))                          # back to NCDHW


# ---------------------------------------------------------------------------
# Pure-JAX reference (mirrors the PyTorch forward in eval mode)
# ---------------------------------------------------------------------------
def reference_forward(x, p, *, temp_k, stride, num_groups,
                      stride_1x1=False, dilation=1, eps=1e-5):
    str1, str3 = (stride, 1) if stride_1x1 else (1, stride)

    def bn(y, g, b, m, v):
        s = (1, -1, 1, 1, 1)
        return (y - m.reshape(s)) / jnp.sqrt(v.reshape(s) + eps) \
            * g.reshape(s) + b.reshape(s)

    dn = ('NCDHW', 'OIDHW', 'NCDHW')
    y = lax.conv_general_dilated(
        x, p["a_w"], (1, str1, str1),
        [(temp_k // 2, temp_k // 2), (0, 0), (0, 0)],
        dimension_numbers=lax.conv_dimension_numbers(x.shape, p["a_w"].shape, dn))
    y = jnp.maximum(bn(y, p["a_gamma"], p["a_beta"], p["a_mean"], p["a_var"]), 0.)
    y = lax.conv_general_dilated(
        y, p["b_w"], (1, str3, str3),
        [(0, 0), (dilation, dilation), (dilation, dilation)],
        rhs_dilation=(1, dilation, dilation),
        dimension_numbers=lax.conv_dimension_numbers(y.shape, p["b_w"].shape, dn),
        feature_group_count=num_groups)
    y = jnp.maximum(bn(y, p["b_gamma"], p["b_beta"], p["b_mean"], p["b_var"]), 0.)
    y = lax.conv_general_dilated(
        y, p["c_w"], (1, 1, 1), [(0, 0), (0, 0), (0, 0)],
        dimension_numbers=lax.conv_dimension_numbers(y.shape, p["c_w"].shape, dn))
    return bn(y, p["c_gamma"], p["c_beta"], p["c_mean"], p["c_var"])


if __name__ == "__main__":
    configs = [
        # small channels, stride on the 3x3, block-diag fallback path
        dict(dim_in=4, dim_out=16, dim_inner=8, temp_k=3, stride=2,
             num_groups=2, dilation=1, stride_1x1=False,
             N=2, T=4, H=8, W=8, rtol=2e-2, atol=2e-2),
        # cpg=128 -> real per-group path, stride on the 1x1, stride-1 3x3 path
        dict(dim_in=16, dim_out=32, dim_inner=256, temp_k=3, stride=2,
             num_groups=2, dilation=1, stride_1x1=True,
             N=1, T=2, H=8, W=8, rtol=5e-2, atol=5e-2),
    ]
    key = jax.random.PRNGKey(0)
    for cfg in configs:
        key, kx, kp = jax.random.split(key, 3)
        x = jax.random.normal(
            kx, (cfg["N"], cfg["dim_in"], cfg["T"], cfg["H"], cfg["W"]), jnp.float32)
        params = init_params(kp, cfg["dim_in"], cfg["dim_out"], cfg["temp_k"],
                             cfg["dim_inner"], cfg["num_groups"])

        out = bottleneck_transform_forward(
            x, params, temp_k=cfg["temp_k"], stride=cfg["stride"],
            num_groups=cfg["num_groups"], stride_1x1=cfg["stride_1x1"],
            dilation=cfg["dilation"])
        out = jax.block_until_ready(out)

        ref = reference_forward(
            x, params, temp_k=cfg["temp_k"], stride=cfg["stride"],
            num_groups=cfg["num_groups"], stride_1x1=cfg["stride_1x1"],
            dilation=cfg["dilation"])
        ref = jax.block_until_ready(ref)

        assert out.shape == ref.shape, (out.shape, ref.shape)
        # bf16 inputs/weights/intermediates with f32 accumulation -> loosened tol.
        np.testing.assert_allclose(np.asarray(out), np.asarray(ref),
                                   rtol=cfg["rtol"], atol=cfg["atol"])
    print("KERNEL_OK")
</pallas_src>

<mosaic_0001>
module attributes {stable_mosaic.version = 11 : i64} {
  func.func @_conv_a_kernel(%arg0: i32, %arg1: i32, %arg2: memref<1x384x4xbf16, #tpu.memory_space<vmem>>, %arg3: memref<3x4x8xbf16, #tpu.memory_space<vmem>>, %arg4: memref<1x8xf32, #tpu.memory_space<vmem>>, %arg5: memref<1x256x8xbf16, #tpu.memory_space<vmem>>) attributes {dimension_semantics = [#tpu.dimension_semantics<parallel>, #tpu.dimension_semantics<parallel>], iteration_bounds = array<i64: 2, 1>, scalar_prefetch = 0 : i64, scratch_operands = 0 : i64, tpu.core_type = #tpu.core_type<tc>, window_params = [{transform_indices = @transform_0, window_bounds = array<i64: 1, 384, 4>}, {pipeline_mode = #tpu.pipeline_mode<synchronous>, transform_indices = @transform_1, window_bounds = array<i64: 3, 4, 8>}, {pipeline_mode = #tpu.pipeline_mode<synchronous>, transform_indices = @transform_2, window_bounds = array<i64: 1, 8>}, {transform_indices = @transform_3, window_bounds = array<i64: 1, 256, 8>}]} {
    %c256_i32 = arith.constant 256 : i32
    %0 = arith.muli %arg1, %c256_i32 : i32
    %1 = tpu.assume_multiple %0, 256 : i32
    %c0_i32 = arith.constant 0 : i32
    %2 = arith.addi %1, %c0_i32 : i32
    %c0 = arith.constant 0 : index
    %3 = arith.index_cast %2 : i32 to index
    %c0_0 = arith.constant 0 : index
    %4 = vector.load %arg2[%c0, %3, %c0_0] : memref<1x384x4xbf16, #tpu.memory_space<vmem>>, vector<1x256x4xbf16>
    %5 = vector.shape_cast %4 : vector<1x256x4xbf16> to vector<256x4xbf16>
    %c0_1 = arith.constant 0 : index
    %c0_2 = arith.constant 0 : index
    %c0_3 = arith.constant 0 : index
    %6 = vector.load %arg3[%c0_1, %c0_2, %c0_3] : memref<3x4x8xbf16, #tpu.memory_space<vmem>>, vector<1x4x8xbf16>
    %7 = vector.shape_cast %6 : vector<1x4x8xbf16> to vector<4x8xbf16>
    %cst = arith.constant dense<0.000000e+00> : vector<256x8xf32>
    %8 = tpu.matmul %5, %7, %cst {dimension_numbers = #tpu.dot_dimension_numbers<[1], [0], [0], [1], [0, 0, 1, 1], [], []>} : vector<256x4xbf16>, vector<4x8xbf16>, vector<256x8xf32> -> vector<256x8xf32>
    %c64_i32 = arith.constant 64 : i32
    %9 = arith.addi %1, %c64_i32 : i32
    %c0_4 = arith.constant 0 : index
    %10 = arith.index_cast %9 : i32 to index
    %c0_5 = arith.constant 0 : index
    %11 = vector.load %arg2[%c0_4, %10, %c0_5] : memref<1x384x4xbf16, #tpu.memory_space<vmem>>, vector<1x256x4xbf16>
    %12 = vector.shape_cast %11 : vector<1x256x4xbf16> to vector<256x4xbf16>
    %c1 = arith.constant 1 : index
    %c0_6 = arith.constant 0 : index
    %c0_7 = arith.constant 0 : index
    %13 = vector.load %arg3[%c1, %c0_6, %c0_7] : memref<3x4x8xbf16, #tpu.memory_space<vmem>>, vector<1x4x8xbf16>
    %14 = vector.shape_cast %13 : vector<1x4x8xbf16> to vector<4x8xbf16>
    %cst_8 = arith.constant dense<0.000000e+00> : vector<256x8xf32>
    %15 = tpu.matmul %12, %14, %cst_8 {dimension_numbers = #tpu.dot_dimension_numbers<[1], [0], [0], [1], [0, 0, 1, 1], [], []>} : vector<256x4xbf16>, vector<4x8xbf16>, vector<256x8xf32> -> vector<256x8xf32>
    %16 = arith.addf %8, %15 : vector<256x8xf32>
    %c128_i32 = arith.constant 128 : i32
    %17 = arith.addi %1, %c128_i32 : i32
    %c0_9 = arith.constant 0 : index
    %18 = arith.index_cast %17 : i32 to index
    %c0_10 = arith.constant 0 : index
    %19 = vector.load %arg2[%c0_9, %18, %c0_10] : memref<1x384x4xbf16, #tpu.memory_space<vmem>>, vector<1x256x4xbf16>
    %20 = vector.shape_cast %19 : vector<1x256x4xbf16> to vector<256x4xbf16>
    %c2 = arith.constant 2 : index
    %c0_11 = arith.constant 0 : index
    %c0_12 = arith.constant 0 : index
    %21 = vector.load %arg3[%c2, %c0_11, %c0_12] : memref<3x4x8xbf16, #tpu.memory_space<vmem>>, vector<1x4x8xbf16>
    %22 = vector.shape_cast %21 : vector<1x4x8xbf16> to vector<4x8xbf16>
    %cst_13 = arith.constant dense<0.000000e+00> : vector<256x8xf32>
    %23 = tpu.matmul %20, %22, %cst_13 {dimension_numbers = #tpu.dot_dimension_numbers<[1], [0], [0], [1], [0, 0, 1, 1], [], []>} : vector<256x4xbf16>, vector<4x8xbf16>, vector<256x8xf32> -> vector<256x8xf32>
    %24 = arith.addf %16, %23 : vector<256x8xf32>
    %c0_14 = arith.constant 0 : index
    %c0_15 = arith.constant 0 : index
    %25 = vector.load %arg4[%c0_14, %c0_15] : memref<1x8xf32, #tpu.memory_space<vmem>>, vector<1x8xf32>
    %26 = vector.broadcast %25 : vector<1x8xf32> to vector<256x8xf32>
    %27 = arith.addf %24, %26 : vector<256x8xf32>
    %cst_16 = arith.constant 0.000000e+00 : f32
    %28 = vector.broadcast %cst_16 : f32 to vector<256x8xf32>
    %29 = arith.maximumf %27, %28 : vector<256x8xf32>
    %30 = arith.truncf %29 : vector<256x8xf32> to vector<256x8xbf16>
    %c0_17 = arith.constant 0 : index
    %c0_18 = arith.constant 0 : index
    %c0_19 = arith.constant 0 : index
    %31 = vector.load %arg5[%c0_17, %c0_18, %c0_19] : memref<1x256x8xbf16, #tpu.memory_space<vmem>>, vector<1x256x8xbf16>
    %32 = vector.shape_cast %31 : vector<1x256x8xbf16> to vector<256x8xbf16>
    %33 = vector.shape_cast %30 : vector<256x8xbf16> to vector<1x256x8xbf16>
    tpu.vector_store %arg5[%c0_17, %c0_18, %c0_19], %33 {strides = array<i32>} : memref<1x256x8xbf16, #tpu.memory_space<vmem>>, vector<1x256x8xbf16>,
    return
  }
  func.func @transform_0(%arg0: i32, %arg1: i32) -> (i32, i32, i32) {
    %c0_i32 = arith.constant 0 : i32
    %c0_i32_0 = arith.constant 0 : i32
    %c0_i32_1 = arith.constant 0 : i32
    return %arg0, %c0_i32, %c0_i32_0 : i32, i32, i32
  }
  func.func @transform_1(%arg0: i32, %arg1: i32) -> (i32, i32, i32) {
    %c0_i32 = arith.constant 0 : i32
    %c0_i32_0 = arith.constant 0 : i32
    %c0_i32_1 = arith.constant 0 : i32
    %c0_i32_2 = arith.constant 0 : i32
    return %c0_i32, %c0_i32_0, %c0_i32_1 : i32, i32, i32
  }
  func.func @transform_2(%arg0: i32, %arg1: i32) -> (i32, i32) {
    %c0_i32 = arith.constant 0 : i32
    %c0_i32_0 = arith.constant 0 : i32
    %c0_i32_1 = arith.constant 0 : i32
    return %c0_i32, %c0_i32_0 : i32, i32
  }
  func.func @transform_3(%arg0: i32, %arg1: i32) -> (i32, i32, i32) {
    %c0_i32 = arith.constant 0 : i32
    %c0_i32_0 = arith.constant 0 : i32
    return %arg0, %arg1, %c0_i32 : i32, i32, i32
  }
}

</mosaic_0001>

<bundles_post_ra>
// kernel: tpu_custom_call.1
= control target key start
LH: loop header
LB: loop body
LE: loop exit
PB: predicated region body
PF: predicated region fallthrough
CT: control target
= control target key end

     0   :  { %s2054_s12 = smov 0   ;;  %s2056_s13 = smov 0   ;;  %s2386_s0 = inlined_call_operand.vmem [shape: bf16[2,384,4], index: 0, kind: input, shape index: {}]   ;;  %s2387_s1 = inlined_call_operand.vmem [shape: bf16[3,4,8], index: 1, kind: input, shape index: {}]   ;;  %s2388_s2 = inlined_call_operand.vmem [shape: f32[1,8], index: 2, kind: input, shape index: {}]   ;;  %s2389_s3 = inlined_call_operand.vmem [shape: bf16[2,256,8], index: 3, kind: output, shape index: {}]  }
   0x1   :  { %s2058_s14 = smov 0  }
   0x2 LB: > { %s25_s15 = sadd.s32 1, %s2028_s13  ;;  %p1544_p0 = scmp.ge.s32.totalorder %s2032_s14, 1  ;;  %s2032_s14 = sphi %s2058_s14, %s13_s14   ;;  %s2028_s13 = sphi %s2056_s13, %s2391_s13   ;;  %s2024_s12 = sphi %s2054_s12, %s2390_s12  }
   0x3   : > { %p27_p1 = scmp.ge.s32.totalorder %s25_s15, 2  ;;  %p151_p2 = scmp.lt.s32.totalorder %s2032_s14, 3 }
   0x5   : > { %s2393_s15 = smov (%p27_p1, %s25_s15), 0  ;;  %p152_p3 = pnand %p1544_p0, %p151_p2 }
   0x6   : > { %p179_p4 = scmp.lt.s32.totalorder (!%p152_p3), %s2024_s12, 1 }
   0x7   : > { %155 = sbr.rel (%p152_p3) target bundleno = 317 (0x13d), region = 32 }
   0xc   : > { %v1580_v0 = vld [vmem:[%s2387_s1 + $0x2] sm:$0x3]  ;;  %vm401_vm0 = vcmask 1041408   ;;  %v232_v2 = vld [vmem:[%s2387_s1] sm:$0x3]  ;;  %s2395_s12 = smov (!%p179_p4, %s2024_s12), 1 }
   0xd   : > { %1934 = vmatprep.subr.msk.bf16.mxu1 %vm401_vm0, %v1580_v0  ;;  %1933 = vmatprep.subr.msk.bf16.mxu0 %vm401_vm0, %v1580_v0  ;;  %v403_v1 = vsel %vm401_vm0, %v1580_v0, 0  ;;  %v1677_v3 = vld [vmem:[%s2387_s1 + $0x4] sm:$0x3]  ;;  %s1937_s22 = smul.u32 192, %s2395_s12  ;;  %vm352_vm1 = vcmask 31744   ;;  %v695_v9 = vsel %vm401_vm0, %v232_v2, 0 }
   0xe   : > { %1932 = vmatpush3.bf16.msra.mxu1 %v403_v1  ;;  %1830 = vmatpush3.bf16.msra.mxu0 %v403_v1  ;;  %v1026_v7 = vsel %vm401_vm0, %v1677_v3, 0  ;;  %s1745_s28 = sshll.u32 %s2395_s12, 7  ;;  %vm1420_vm2 = vcmask 60416  }
   0xf   : > { %1935 = vmatprep.subr.msk.bf16.mxu1 %vm401_vm0, %v232_v2  ;;  %1936 = vmatprep.subr.msk.bf16.mxu0 %vm401_vm0, %v1677_v3  ;;  %s2092_s25 = scalar_lea.vmem %s2386_s0, %s1937_s22  ;;  %s2255_s4 = scalar_lea.vmem %s2389_s3, %s1745_s28 }
  0x10   : > { %v1962_v4 = vld [vmem:[%s2092_s25 + $0x20] sm:$0xff]   ;;  %v1964_v6 = vld [vmem:[%s2092_s25 + $0x28] sm:$0xff]   ;;  %v1966_v10 = vld [vmem:[%s2092_s25 + $0x30] sm:$0xff]  }
  0x11   : > { %v1963_v5 = vld [vmem:[%s2092_s25 + $0x60] sm:$0xff]   ;;  %1831 = vmatprep.mubr.msk.bf16.mxu0 %vm352_vm1, %v1962_v4  ;;  %v1965_v8 = vld [vmem:[%s2092_s25 + $0x68] sm:$0xff]   ;;  %v1967_v11 = vld [vmem:[%s2092_s25 + $0x70] sm:$0xff]  }
  0x12   : > { %1847 = vmatprep.mubr.msk.bf16.mxu1 %vm352_vm1, %v1963_v5  ;;  %1832 = vmatmul.mubr.msk.bf16.vlgmr.msra.gmra.mxu0 %vm352_vm1, %v1964_v6  ;;  %v1968_v12 = vld [vmem:[%s2092_s25 + $0x38] sm:$0xff]   ;;  %v1970_v14 = vld [vmem:[%s2092_s25 + $0x40] sm:$0xff]   ;;  %v1972_v16 = vld [vmem:[%s2092_s25 + $0x48] sm:$0xff]  }
  0x13   : > { %1848 = vmatmul.mubr.msk.bf16.vlgmr.msra.gmra.mxu1 %vm352_vm1, %v1965_v8  ;;  %1898 = vmatpush3.bf16.msra.mxu0 %v1026_v7  ;;  %v1969_v13 = vld [vmem:[%s2092_s25 + $0x78] sm:$0xff]   ;;  %v1971_v15 = vld [vmem:[%s2092_s25 + $0x80] sm:$0xff]   ;;  %v1973_v17 = vld [vmem:[%s2092_s25 + $0x88] sm:$0xff]  }
  0x14   : > { %1864 = vmatpush3.bf16.msra.mxu1 %v695_v9  ;;  %1835 = vmatprep.mubr.msk.bf16.mxu0 %vm352_vm1, %v1966_v10  ;;  %v1974_v18 = vld [vmem:[%s2092_s25 + $0x50] sm:$0xff]   ;;  %v1976_v20 = vld [vmem:[%s2092_s25 + $0x58] sm:$0xff]   ;;  %v1979_v22 = vld [vmem:[%s2092_s25 + $0x40] sm:$0xff]  }
  0x15   : > { %1851 = vmatprep.mubr.msk.bf16.mxu1 %vm352_vm1, %v1967_v11  ;;  %v1975_v19 = vld [vmem:[%s2092_s25 + $0x90] sm:$0xff]   ;;  %v1977_v21 = vld [vmem:[%s2092_s25 + $0x98] sm:$0xff]   ;;  %v1978_v23 = vld [vmem:[%s2092_s25] sm:$0xff]  }
  0x16   : > { %v1980_v24 = vld [vmem:[%s2092_s25 + $0x8] sm:$0xff]   ;;  %v1983_v26 = vld [vmem:[%s2092_s25 + $0x50] sm:$0xff]   ;;  %v1984_v28 = vld [vmem:[%s2092_s25 + $0x18] sm:$0xff]  }
  0x17   : > { %v1981_v25 = vld [vmem:[%s2092_s25 + $0x48] sm:$0xff]   ;;  %v1982_v27 = vld [vmem:[%s2092_s25 + $0x10] sm:$0xff]   ;;  %v1985_v29 = vld [vmem:[%s2092_s25 + $0x58] sm:$0xff]  }
  0x18   : > { %v1987_v30 = vld [vmem:[%s2092_s25 + $0x60] sm:$0xff]   ;;  %v1989_v32 = vld [vmem:[%s2092_s25 + $0x68] sm:$0xff]   ;;  %v1991_v34 = vld [vmem:[%s2092_s25 + $0x70] sm:$0xff]  }
  0x19   : > { %v1986_v31 = vld [vmem:[%s2092_s25 + $0x20] sm:$0xff]   ;;  %v1988_v33 = vld [vmem:[%s2092_s25 + $0x28] sm:$0xff]   ;;  %v1990_v35 = vld [vmem:[%s2092_s25 + $0x30] sm:$0xff]  }
  0x1a   : > { %1836 = vmatmul.mubr.msk.bf16.gmra.mxu0 %vm352_vm1, %v1968_v12  ;;  %v1993_v36 = vld [vmem:[%s2092_s25 + $0x78] sm:$0xff]   ;;  %v1995_v38 = vld [vmem:[%s2092_s25 + $0x80] sm:$0xff]   ;;  %v1997_v40 = vld [vmem:[%s2092_s25 + $0x88] sm:$0xff]  }
  0x1b   : > { %1852 = vmatmul.mubr.msk.bf16.gmra.mxu1 %vm352_vm1, %v1969_v13  ;;  %1839 = vmatprep.mubr.msk.bf16.mxu0 %vm352_vm1, %v1970_v14  ;;  %v1992_v37 = vld [vmem:[%s2092_s25 + $0x38] sm:$0xff]   ;;  %v1994_v39 = vld [vmem:[%s2092_s25 + $0x40] sm:$0xff]   ;;  %v1996_v41 = vld [vmem:[%s2092_s25 + $0x48] sm:$0xff]  }
  0x1c   : > { %1855 = vmatprep.mubr.msk.bf16.mxu1 %vm352_vm1, %v1971_v15  ;;  %v1999_v42 = vld [vmem:[%s2092_s25 + $0x90] sm:$0xff]   ;;  %v2001_v44 = vld [vmem:[%s2092_s25 + $0x98] sm:$0xff]   ;;  %v2003_v46 = vld [vmem:[%s2092_s25 + $0xa0] sm:$0xff]  }
  0x1d   : > { %v1998_v43 = vld [vmem:[%s2092_s25 + $0x50] sm:$0xff]   ;;  %v2000_v45 = vld [vmem:[%s2092_s25 + $0x58] sm:$0xff]   ;;  %v2002_v47 = vld [vmem:[%s2092_s25 + $0x60] sm:$0xff]  }
  0x1e   : > { %v2005_v48 = vld [vmem:[%s2092_s25 + $0xa8] sm:$0xff]   ;;  %v2007_v50 = vld [vmem:[%s2092_s25 + $0xb0] sm:$0xff]   ;;  %v2009_v52 = vld [vmem:[%s2092_s25 + $0xb8] sm:$0xff]  }
  0x1f   : > { %v2004_v49 = vld [vmem:[%s2092_s25 + $0x68] sm:$0xff]   ;;  %v2006_v51 = vld [vmem:[%s2092_s25 + $0x70] sm:$0xff]   ;;  %v2008_v53 = vld [vmem:[%s2092_s25 + $0x78] sm:$0xff]  }
  0x22   : > { %1840 = vmatmul.mubr.msk.bf16.gmra.mxu0 %vm352_vm1, %v1972_v16 }
  0x23   : > { %1856 = vmatmul.mubr.msk.bf16.gmra.mxu1 %vm352_vm1, %v1973_v17  ;;  %1843 = vmatprep.mubr.msk.bf16.mxu0 %vm352_vm1, %v1974_v18 }
  0x24   : > { %1859 = vmatprep.mubr.msk.bf16.mxu1 %vm352_vm1, %v1975_v19 }
  0x2a   : > { %1844 = vmatmul.mubr.msk.bf16.gmra.mxu0 %vm352_vm1, %v1976_v20 }
  0x2b   : > { %1860 = vmatmul.mubr.msk.bf16.gmra.mxu1 %vm352_vm1, %v1977_v21  ;;  %1899 = vmatprep.mubr.msk.bf16.mxu0 %vm352_vm1, %v1979_v22 }
  0x2c   : > { %1865 = vmatprep.mubr.msk.bf16.mxu1 %vm352_vm1, %v1978_v23 }
  0x32   : > { %1900 = vmatmul.mubr.msk.bf16.vlgmr.msra.gmra.mxu0 %vm352_vm1, %v1981_v25 }
  0x33   : > { %1866 = vmatmul.mubr.msk.bf16.vlgmr.msra.gmra.mxu1 %vm352_vm1, %v1980_v24  ;;  %1903 = vmatprep.mubr.msk.bf16.mxu0 %vm352_vm1, %v1983_v26  ;;  %v2247_v26 = vld [vmem:[%s2388_s2] ss:$0 sm:$0xff] }
  0x34   : > { %1869 = vmatprep.mubr.msk.bf16.mxu1 %vm352_vm1, %v1982_v27 }
  0x3a   : > { %1904 = vmatmul.mubr.msk.bf16.gmra.mxu0 %vm352_vm1, %v1985_v29 }
  0x3b   : > { %1870 = vmatmul.mubr.msk.bf16.gmra.mxu1 %vm352_vm1, %v1984_v28  ;;  %1907 = vmatprep.mubr.msk.bf16.mxu0 %vm352_vm1, %v1987_v30 }
  0x3c   : > { %1873 = vmatprep.mubr.msk.bf16.mxu1 %vm352_vm1, %v1986_v31 }
  0x42   : > { %1908 = vmatmul.mubr.msk.bf16.gmra.mxu0 %vm352_vm1, %v1989_v32 }
  0x43   : > { %1874 = vmatmul.mubr.msk.bf16.gmra.mxu1 %vm352_vm1, %v1988_v33  ;;  %1911 = vmatprep.mubr.msk.bf16.mxu0 %vm352_vm1, %v1991_v34 }
  0x44   : > { %1877 = vmatprep.mubr.msk.bf16.mxu1 %vm352_vm1, %v1990_v35 }
  0x4a   : > { %1912 = vmatmul.mubr.msk.bf16.gmra.mxu0 %vm352_vm1, %v1993_v36 }
  0x4b   : > { %1878 = vmatmul.mubr.msk.bf16.gmra.mxu1 %vm352_vm1, %v1992_v37  ;;  %1915 = vmatprep.mubr.msk.bf16.mxu0 %vm352_vm1, %v1995_v38 }
  0x4c   : > { %1881 = vmatprep.mubr.msk.bf16.mxu1 %vm352_vm1, %v1994_v39 }
  0x52   : > { %1916 = vmatmul.mubr.msk.bf16.gmra.mxu0 %vm352_vm1, %v1997_v40 }
  0x53   : > { %1882 = vmatmul.mubr.msk.bf16.gmra.mxu1 %vm352_vm1, %v1996_v41  ;;  %1919 = vmatprep.mubr.msk.bf16.mxu0 %vm352_vm1, %v1999_v42 }
  0x54   : > { %1885 = vmatprep.mubr.msk.bf16.mxu1 %vm352_vm1, %v1998_v43 }
  0x5a   : > { %1920 = vmatmul.mubr.msk.bf16.gmra.mxu0 %vm352_vm1, %v2001_v44 }
  0x5b   : > { %1886 = vmatmul.mubr.msk.bf16.gmra.mxu1 %vm352_vm1, %v2000_v45  ;;  %1923 = vmatprep.mubr.msk.bf16.mxu0 %vm352_vm1, %v2003_v46 }
  0x5c   : > { %1889 = vmatprep.mubr.msk.bf16.mxu1 %vm352_vm1, %v2002_v47 }
  0x62   : > { %1924 = vmatmul.mubr.msk.bf16.gmra.mxu0 %vm352_vm1, %v2005_v48 }
  0x63   : > { %1890 = vmatmul.mubr.msk.bf16.gmra.mxu1 %vm352_vm1, %v2004_v49  ;;  %1927 = vmatprep.mubr.msk.bf16.mxu0 %vm352_vm1, %v2007_v50 }
  0x64   : > { %1893 = vmatprep.mubr.msk.bf16.mxu1 %vm352_vm1, %v2006_v51 }
  0x6a   : > { %1928 = vmatmul.mubr.msk.bf16.gmra.mxu0 %vm352_vm1, %v2009_v52 }
  0x6b   : > { %1894 = vmatmul.mubr.msk.bf16.gmra.mxu1 %vm352_vm1, %v2008_v53 }
  0xd2   : > { %v1833_v54 = vpop.f32.mrf.mxu0 }
  0xd3   : > { %v2192_v55 = vpop.f32.mrf.mxu1 }
  0xd4   : > { %v439_v56 = vpop.f32.mrf.mxu0 }
  0xd5   : > { %v2194_v57 = vpop.f32.mrf.mxu1 }
  0xd6   : > { %v1834_v58 = vpop.f32.mrf.mxu0 }
  0xd7   : > { %v2196_v59 = vpop.f32.mrf.mxu1 }
  0xd8   : > { %v442_v60 = vpop.f32.mrf.mxu0 }
  0xd9   : > { %v2198_v61 = vpop.f32.mrf.mxu1 }
  0xda   : > { %v1837_v62 = vpop.f32.mrf.mxu0 }
  0xdb   : > { %v2200_v63 = vpop.f32.mrf.mxu1 }
  0xdc   : > { %v455_v0 = vpop.f32.mrf.mxu0 }
  0xdd   : > { %v2202_v1 = vpop.f32.mrf.mxu1 }
  0xde   : > { %v2204_v2 = vpop.f32.mrf.mxu0 }
  0xdf   : > { %v2206_v3 = vpop.f32.mrf.mxu1 }
  0xe0   : > { %v2208_v4 = vpop.f32.mrf.mxu0 }
  0xe1   : > { %v2210_v5 = vpop.f32.mrf.mxu1 }
  0xe2   : > { %v2212_v6 = vpop.f32.mrf.mxu0 }
  0xe3   : > { %v2214_v7 = vpop.f32.mrf.mxu1 }
  0xe4   : > { %v2216_v8 = vpop.f32.mrf.mxu0 }
  0xe5   : > { %v2218_v9 = vpop.f32.mrf.mxu1 }
  0xe6   : > { %v2220_v10 = vpop.f32.mrf.mxu0 }
  0xe7   : > { %v2222_v11 = vpop.f32.mrf.mxu1 }
  0xe8   : > { %v2224_v12 = vpop.f32.mrf.mxu0 }
  0xe9   : > { %v2226_v13 = vpop.f32.mrf.mxu1 }
  0xea   : > { %v2228_v14 = vpop.f32.mrf.mxu0 }
  0xeb   : > { %v2230_v15 = vpop.f32.mrf.mxu1 }
  0xec   : > { %v2232_v16 = vpop.f32.mrf.mxu0 }
  0xed   : > { %v2234_v17 = vpop.f32.mrf.mxu1 }
  0xee   : > { %v2236_v18 = vpop.f32.mrf.mxu0 }
  0xef   : > { %v2238_v19 = vpop.f32.mrf.mxu1 }
  0xf0   : > { %v2240_v20 = vpop.f32.mrf.mxu0 }
  0xf1   : > { %v2242_v21 = vpop.f32.mrf.mxu1 }
  0xf2   : > { %v1901_v22 = vpop.f32.mrf.mxu0 }
  0xf3   : > { %v1867_v23 = vpop.f32.mrf.mxu1 }
  0xf4   : > { %v740_v24 = vadd.f32 %v1867_v23, %v1833_v54  ;;  %v1062_v25 = vpop.f32.mrf.mxu0 }
  0xf5   : > { %v731_v27 = vpop.f32.mrf.mxu1 }
  0xf6   : > { %v1191_v28 = vadd.f32 %v1901_v22, %v740_v24  ;;  %v732_v29 = vadd.f32 %v731_v27, %v439_v56  ;;  %v1902_v30 = vpop.f32.mrf.mxu0 }
  0xf7   : > { %v1868_v31 = vpop.f32.mrf.mxu1 }
  0xf8   : > { %v1230_v32 = vadd.f32 %v2247_v26, %v1191_v28  ;;  %v1189_v33 = vadd.f32 %v1062_v25, %v732_v29  ;;  %v743_v34 = vadd.f32 %v1868_v31, %v1834_v58  ;;  %v1065_v35 = vpop.f32.mrf.mxu0 }
  0xf9   : > { %v734_v36 = vpop.f32.mrf.mxu1 }
  0xfa   : > { %v1262_v37 = vmax.f32 %v1230_v32, 0.0  ;;  %v1228_v38 = vadd.f32 %v2247_v26, %v1189_v33  ;;  %v1192_v39 = vadd.f32 %v1902_v30, %v743_v34  ;;  %v735_v40 = vadd.f32 %v734_v36, %v442_v60  ;;  %v1905_v41 = vpop.f32.mrf.mxu0 }
  0xfb   : > { %v1871_v42 = vpop.f32.mrf.mxu1 }
  0xfc   : > { %v1748_v43 = vpack.c.bf16 %v1262_v37, %v1262_v37  ;;  %v1260_v44 = vmax.f32 %v1228_v38, 0.0  ;;  %v1231_v45 = vadd.f32 %v2247_v26, %v1192_v39  ;;  %v1190_v46 = vadd.f32 %v1065_v35, %v735_v40  ;;  %v1078_v47 = vpop.f32.mrf.mxu0 }
  0xfd   : > { %v756_v48 = vadd.f32 %v1871_v42, %v1837_v62  ;;  %v747_v49 = vpop.f32.mrf.mxu1 }
  0xfe   : > { %1423 = vst.msk [vmem:[%s2255_s4 + $0x8] sm:$0xf] %vm1420_vm2, %v1748_v43  ;;  %v1746_v50 = vpack.c.bf16 %v1260_v44, %v1260_v44  ;;  %v1263_v51 = vmax.f32 %v1231_v45, 0.0  ;;  %v1229_v52 = vadd.f32 %v2247_v26, %v1190_v46  ;;  %v748_v53 = vadd.f32 %v747_v49, %v455_v0  ;;  %v1906_v54 = vpop.f32.mrf.mxu0 }
  0xff   : > { %v1195_v56 = vadd.f32 %v1905_v41, %v756_v48  ;;  %v1872_v58 = vpop.f32.mrf.mxu1 }
 0x100   : > { %1421 = vst.msk [vmem:[%s2255_s4] sm:$0xf] %vm1420_vm2, %v1746_v50  ;;  %v1749_v60 = vpack.c.bf16 %v1263_v51, %v1263_v51  ;;  %v1261_v22 = vmax.f32 %v1229_v52, 0.0  ;;  %v1193_v23 = vadd.f32 %v1078_v47, %v748_v53  ;;  %v759_v62 = vadd.f32 %v1872_v58, %v2204_v2  ;;  %v1081_v24 = vpop.f32.mrf.mxu0 }
 0x101   : > { %v1234_v25 = vadd.f32 %v2247_v26, %v1195_v56  ;;  %v750_v27 = vpop.f32.mrf.mxu1 }
 0x102   : > { %1424 = vst.msk [vmem:[%s2255_s4 + $0xc] sm:$0xf] %vm1420_vm2, %v1749_v60  ;;  %v1747_v28 = vpack.c.bf16 %v1261_v22, %v1261_v22  ;;  %v1232_v0 = vadd.f32 %v2247_v26, %v1193_v23  ;;  %v1196_v29 = vadd.f32 %v1906_v54, %v759_v62  ;;  %v751_v30 = vadd.f32 %v750_v27, %v2208_v4  ;;  %v1909_v31 = vpop.f32.mrf.mxu0 }
 0x103   : > { %v1266_v32 = vmax.f32 %v1234_v25, 0.0  ;;  %v1875_v33 = vpop.f32.mrf.mxu1 }
 0x104   : > { %1422 = vst.msk [vmem:[%s2255_s4 + $0x4] sm:$0xf] %vm1420_vm2, %v1747_v28  ;;  %v1264_v2 = vmax.f32 %v1232_v0, 0.0  ;;  %v1235_v34 = vadd.f32 %v2247_v26, %v1196_v29  ;;  %v1194_v35 = vadd.f32 %v1081_v24, %v751_v30  ;;  %v772_v36 = vadd.f32 %v1875_v33, %v2212_v6  ;;  %v1094_v37 = vpop.f32.mrf.mxu0 }
 0x105   : > { %v1752_v38 = vpack.c.bf16 %v1266_v32, %v1266_v32  ;;  %v763_v39 = vpop.f32.mrf.mxu1 }
 0x106   : > { %v1750_v40 = vpack.c.bf16 %v1264_v2, %v1264_v2  ;;  %v1267_v41 = vmax.f32 %v1235_v34, 0.0  ;;  %v1233_v4 = vadd.f32 %v2247_v26, %v1194_v35  ;;  %v1199_v42 = vadd.f32 %v1909_v31, %v772_v36  ;;  %v1910_v43 = vpop.f32.mrf.mxu0 }
 0x107   : > { %1427 = vst.msk [vmem:[%s2255_s4 + $0x18] sm:$0xf] %vm1420_vm2, %v1752_v38  ;;  %v764_v44 = vadd.f32 %v763_v39, %v2216_v8  ;;  %v1876_v45 = vpop.f32.mrf.mxu1 }
 0x108   : > { %1425 = vst.msk [vmem:[%s2255_s4 + $0x10] sm:$0xf] %vm1420_vm2, %v1750_v40  ;;  %v1753_v46 = vpack.c.bf16 %v1267_v41, %v1267_v41  ;;  %v1265_v6 = vmax.f32 %v1233_v4, 0.0  ;;  %v1238_v47 = vadd.f32 %v2247_v26, %v1199_v42  ;;  %v775_v48 = vadd.f32 %v1876_v45, %v2220_v10  ;;  %v1097_v49 = vpop.f32.mrf.mxu0 }
 0x109   : > { %v1197_v50 = vadd.f32 %v1094_v37, %v764_v44  ;;  %v766_v51 = vpop.f32.mrf.mxu1 }
 0x10a   : > { %1428 = vst.msk [vmem:[%s2255_s4 + $0x1c] sm:$0xf] %vm1420_vm2, %v1753_v46  ;;  %v1751_v52 = vpack.c.bf16 %v1265_v6, %v1265_v6  ;;  %v1270_v53 = vmax.f32 %v1238_v47, 0.0  ;;  %v1200_v54 = vadd.f32 %v1910_v43, %v775_v48  ;;  %v767_v8 = vadd.f32 %v766_v51, %v2224_v12  ;;  %v1913_v56 = vpop.f32.mrf.mxu0 }
 0x10b   : > { %v1236_v58 = vadd.f32 %v2247_v26, %v1197_v50  ;;  %v1879_v60 = vpop.f32.mrf.mxu1 }
 0x10c   : > { %1426 = vst.msk [vmem:[%s2255_s4 + $0x14] sm:$0xf] %vm1420_vm2, %v1751_v52  ;;  %v1756_v22 = vpack.c.bf16 %v1270_v53, %v1270_v53  ;;  %v1239_v10 = vadd.f32 %v2247_v26, %v1200_v54  ;;  %v1198_v23 = vadd.f32 %v1097_v49, %v767_v8  ;;  %v788_v62 = vadd.f32 %v1879_v60, %v2228_v14  ;;  %v1110_v24 = vpop.f32.mrf.mxu0 }
 0x10d   : > { %v1268_v25 = vmax.f32 %v1236_v58, 0.0  ;;  %v779_v27 = vpop.f32.mrf.mxu1 }
 0x10e   : > { %1431 = vst.msk [vmem:[%s2255_s4 + $0x28] sm:$0xf] %vm1420_vm2, %v1756_v22  ;;  %v1271_v12 = vmax.f32 %v1239_v10, 0.0  ;;  %v1237_v28 = vadd.f32 %v2247_v26, %v1198_v23  ;;  %v1203_v0 = vadd.f32 %v1913_v56, %v788_v62  ;;  %v780_v29 = vadd.f32 %v779_v27, %v2232_v16  ;;  %v1914_v30 = vpop.f32.mrf.mxu0 }
 0x10f   : > { %v1754_v31 = vpack.c.bf16 %v1268_v25, %v1268_v25  ;;  %v1880_v32 = vpop.f32.mrf.mxu1 }
 0x110   : > { %v1757_v33 = vpack.c.bf16 %v1271_v12, %v1271_v12  ;;  %v1269_v2 = vmax.f32 %v1237_v28, 0.0  ;;  %v1242_v14 = vadd.f32 %v2247_v26, %v1203_v0  ;;  %v1201_v34 = vadd.f32 %v1110_v24, %v780_v29  ;;  %v1113_v35 = vpop.f32.mrf.mxu0 }
 0x111   : > { %1429 = vst.msk [vmem:[%s2255_s4 + $0x20] sm:$0xf] %vm1420_vm2, %v1754_v31  ;;  %v791_v36 = vadd.f32 %v1880_v32, %v2236_v18  ;;  %v782_v37 = vpop.f32.mrf.mxu1 }
 0x112   : > { %1432 = vst.msk [vmem:[%s2255_s4 + $0x2c] sm:$0xf] %vm1420_vm2, %v1757_v33  ;;  %v1755_v38 = vpack.c.bf16 %v1269_v2, %v1269_v2  ;;  %v1274_v16 = vmax.f32 %v1242_v14, 0.0  ;;  %v1240_v39 = vadd.f32 %v2247_v26, %v1201_v34  ;;  %v783_v40 = vadd.f32 %v782_v37, %v2240_v20  ;;  %v1917_v41 = vpop.f32.mrf.mxu0 }
 0x113   : > { %v1204_v4 = vadd.f32 %v1914_v30, %v791_v36  ;;  %v1883_v42 = vpop.f32.mrf.mxu1 }
 0x114   : > { %1430 = vst.msk [vmem:[%s2255_s4 + $0x24] sm:$0xf] %vm1420_vm2, %v1755_v38  ;;  %v1760_v43 = vpack.c.bf16 %v1274_v16, %v1274_v16  ;;  %v1272_v44 = vmax.f32 %v1240_v39, 0.0  ;;  %v1202_v45 = vadd.f32 %v1113_v35, %v783_v40  ;;  %v804_v18 = vadd.f32 %v1883_v42, %v2192_v55  ;;  %v1126_v46 = vpop.f32.mrf.mxu0 }
 0x115   : > { %v1243_v6 = vadd.f32 %v2247_v26, %v1204_v4  ;;  %v795_v47 = vpop.f32.mrf.mxu1 }
 0x116   : > { %1435 = vst.msk [vmem:[%s2255_s4 + $0x38] sm:$0xf] %vm1420_vm2, %v1760_v43  ;;  %v1758_v48 = vpack.c.bf16 %v1272_v44, %v1272_v44  ;;  %v1241_v20 = vadd.f32 %v2247_v26, %v1202_v45  ;;  %v1207_v49 = vadd.f32 %v1917_v41, %v804_v18  ;;  %v796_v50 = vadd.f32 %v795_v47, %v2194_v57  ;;  %v1918_v51 = vpop.f32.mrf.mxu0 }
 0x117   : > { %v1275_v52 = vmax.f32 %v1243_v6, 0.0  ;;  %v1884_v53 = vpop.f32.mrf.mxu1 }
 0x118   : > { %1433 = vst.msk [vmem:[%s2255_s4 + $0x30] sm:$0xf] %vm1420_vm2, %v1758_v48  ;;  %v1273_v55 = vmax.f32 %v1241_v20, 0.0  ;;  %v1246_v54 = vadd.f32 %v2247_v26, %v1207_v49  ;;  %v1205_v8 = vadd.f32 %v1126_v46, %v796_v50  ;;  %v807_v56 = vadd.f32 %v1884_v53, %v2196_v59  ;;  %v1129_v58 = vpop.f32.mrf.mxu0 }
 0x119   : > { %v1761_v60 = vpack.c.bf16 %v1275_v52, %v1275_v52  ;;  %v798_v22 = vpop.f32.mrf.mxu1 }
 0x11a   : > { %v1759_v10 = vpack.c.bf16 %v1273_v55, %v1273_v55  ;;  %v1278_v23 = vmax.f32 %v1246_v54, 0.0  ;;  %v1244_v57 = vadd.f32 %v2247_v26, %v1205_v8  ;;  %v1208_v62 = vadd.f32 %v1918_v51, %v807_v56  ;;  %v1921_v24 = vpop.f32.mrf.mxu0 }
 0x11b   : > { %1436 = vst.msk [vmem:[%s2255_s4 + $0x3c] sm:$0xf] %vm1420_vm2, %v1761_v60  ;;  %v799_v25 = vadd.f32 %v798_v22, %v2198_v61  ;;  %v1887_v27 = vpop.f32.mrf.mxu1 }
 0x11c   : > { %1434 = vst.msk [vmem:[%s2255_s4 + $0x34] sm:$0xf] %vm1420_vm2, %v1759_v10  ;;  %v1764_v12 = vpack.c.bf16 %v1278_v23, %v1278_v23  ;;  %v1276_v59 = vmax.f32 %v1244_v57, 0.0  ;;  %v1247_v28 = vadd.f32 %v2247_v26, %v1208_v62  ;;  %v820_v0 = vadd.f32 %v1887_v27, %v2200_v63  ;;  %v1142_v29 = vpop.f32.mrf.mxu0 }
 0x11d   : > { %v1206_v30 = vadd.f32 %v1129_v58, %v799_v25  ;;  %v811_v31 = vpop.f32.mrf.mxu1 }
 0x11e   : > { %1439 = vst.msk [vmem:[%s2255_s4 + $0x48] sm:$0xf] %vm1420_vm2, %v1764_v12  ;;  %v1762_v32 = vpack.c.bf16 %v1276_v59, %v1276_v59  ;;  %v1279_v33 = vmax.f32 %v1247_v28, 0.0  ;;  %v1211_v2 = vadd.f32 %v1921_v24, %v820_v0  ;;  %v812_v61 = vadd.f32 %v811_v31, %v2202_v1  ;;  %v1922_v14 = vpop.f32.mrf.mxu0 }
 0x11f   : > { %v1245_v34 = vadd.f32 %v2247_v26, %v1206_v30  ;;  %v1888_v35 = vpop.f32.mrf.mxu1 }
 0x120   : > { %1437 = vst.msk [vmem:[%s2255_s4 + $0x40] sm:$0xf] %vm1420_vm2, %v1762_v32  ;;  %v1765_v36 = vpack.c.bf16 %v1279_v33, %v1279_v33  ;;  %v1250_v63 = vadd.f32 %v2247_v26, %v1211_v2  ;;  %v1209_v37 = vadd.f32 %v1142_v29, %v812_v61  ;;  %v823_v38 = vadd.f32 %v1888_v35, %v2206_v3  ;;  %v1145_v16 = vpop.f32.mrf.mxu0 }
 0x121   : > { %v1277_v39 = vmax.f32 %v1245_v34, 0.0  ;;  %v814_v40 = vpop.f32.mrf.mxu1 }
 0x122   : > { %1440 = vst.msk [vmem:[%s2255_s4 + $0x4c] sm:$0xf] %vm1420_vm2, %v1765_v36  ;;  %v1282_v1 = vmax.f32 %v1250_v63, 0.0  ;;  %v1248_v41 = vadd.f32 %v2247_v26, %v1209_v37  ;;  %v1212_v4 = vadd.f32 %v1922_v14, %v823_v38  ;;  %v815_v42 = vadd.f32 %v814_v40, %v2210_v5  ;;  %v1925_v43 = vpop.f32.mrf.mxu0 }
 0x123   : > { %v1763_v44 = vpack.c.bf16 %v1277_v39, %v1277_v39  ;;  %v1891_v45 = vpop.f32.mrf.mxu1 }
 0x124   : > { %v1768_v18 = vpack.c.bf16 %v1282_v1, %v1282_v1  ;;  %v1280_v46 = vmax.f32 %v1248_v41, 0.0  ;;  %v1251_v3 = vadd.f32 %v2247_v26, %v1212_v4  ;;  %v1210_v6 = vadd.f32 %v1145_v16, %v815_v42  ;;  %v1158_v47 = vpop.f32.mrf.mxu0 }
 0x125   : > { %1438 = vst.msk [vmem:[%s2255_s4 + $0x44] sm:$0xf] %vm1420_vm2, %v1763_v44  ;;  %v836_v48 = vadd.f32 %v1891_v45, %v2214_v7  ;;  %v827_v20 = vpop.f32.mrf.mxu1 }
 0x126   : > { %1443 = vst.msk [vmem:[%s2255_s4 + $0x58] sm:$0xf] %vm1420_vm2, %v1768_v18  ;;  %v1766_v49 = vpack.c.bf16 %v1280_v46, %v1280_v46  ;;  %v1283_v5 = vmax.f32 %v1251_v3, 0.0  ;;  %v1249_v50 = vadd.f32 %v2247_v26, %v1210_v6  ;;  %v828_v51 = vadd.f32 %v827_v20, %v2218_v9  ;;  %v1926_v52 = vpop.f32.mrf.mxu0 }
 0x127   : > { %v1215_v53 = vadd.f32 %v1925_v43, %v836_v48  ;;  %v1892_v55 = vpop.f32.mrf.mxu1 }
 0x128   : > { %1441 = vst.msk [vmem:[%s2255_s4 + $0x50] sm:$0xf] %vm1420_vm2, %v1766_v49  ;;  %v1769_v54 = vpack.c.bf16 %v1283_v5, %v1283_v5  ;;  %v1281_v8 = vmax.f32 %v1249_v50, 0.0  ;;  %v1213_v56 = vadd.f32 %v1158_v47, %v828_v51  ;;  %v839_v7 = vadd.f32 %v1892_v55, %v2222_v11  ;;  %v1161_v58 = vpop.f32.mrf.mxu0 }
 0x129   : > { %v1254_v60 = vadd.f32 %v2247_v26, %v1215_v53  ;;  %v830_v22 = vpop.f32.mrf.mxu1 }
 0x12a   : > { %1444 = vst.msk [vmem:[%s2255_s4 + $0x5c] sm:$0xf] %vm1420_vm2, %v1769_v54  ;;  %v1767_v10 = vpack.c.bf16 %v1281_v8, %v1281_v8  ;;  %v1252_v9 = vadd.f32 %v2247_v26, %v1213_v56  ;;  %v1216_v23 = vadd.f32 %v1926_v52, %v839_v7  ;;  %v831_v57 = vadd.f32 %v830_v22, %v2226_v13  ;;  %v1929_v62 = vpop.f32.mrf.mxu0 }
 0x12b   : > { %v1286_v24 = vmax.f32 %v1254_v60, 0.0  ;;  %v1895_v25 = vpop.f32.mrf.mxu1 }
 0x12c   : > { %1442 = vst.msk [vmem:[%s2255_s4 + $0x54] sm:$0xf] %vm1420_vm2, %v1767_v10  ;;  %v1284_v11 = vmax.f32 %v1252_v9, 0.0  ;;  %v1255_v27 = vadd.f32 %v2247_v26, %v1216_v23  ;;  %v1214_v12 = vadd.f32 %v1161_v58, %v831_v57  ;;  %v852_v59 = vadd.f32 %v1895_v25, %v2230_v15  ;;  %v1174_v28 = vpop.f32.mrf.mxu0 }
 0x12d   : > { %v1772_v0 = vpack.c.bf16 %v1286_v24, %v1286_v24  ;;  %v843_v29 = vpop.f32.mrf.mxu1 }
 0x12e   : > { %v1770_v30 = vpack.c.bf16 %v1284_v11, %v1284_v11  ;;  %v1287_v31 = vmax.f32 %v1255_v27, 0.0  ;;  %v1253_v13 = vadd.f32 %v2247_v26, %v1214_v12  ;;  %v1219_v32 = vadd.f32 %v1929_v62, %v852_v59  ;;  %v1930_v61 = vpop.f32.mrf.mxu0 }
 0x12f   : > { %1447 = vst.msk [vmem:[%s2255_s4 + $0x68] sm:$0xf] %vm1420_vm2, %v1772_v0  ;;  %v844_v33 = vadd.f32 %v843_v29, %v2234_v17  ;;  %v1896_v2 = vpop.f32.mrf.mxu1 }
 0x130   : > { %1445 = vst.msk [vmem:[%s2255_s4 + $0x60] sm:$0xf] %vm1420_vm2, %v1770_v30  ;;  %v1773_v14 = vpack.c.bf16 %v1287_v31, %v1287_v31  ;;  %v1285_v15 = vmax.f32 %v1253_v13, 0.0  ;;  %v1258_v34 = vadd.f32 %v2247_v26, %v1219_v32  ;;  %v855_v35 = vadd.f32 %v1896_v2, %v2238_v19  ;;  %v1177_v40 = vpop.f32.mrf.mxu0 }
 0x131   : > { %v1217_v36 = vadd.f32 %v1174_v28, %v844_v33  ;;  %v846_v63 = vpop.f32.mrf.mxu1 }
 0x132   : > { %1448 = vst.msk [vmem:[%s2255_s4 + $0x6c] sm:$0xf] %vm1420_vm2, %v1773_v14  ;;  %v1771_v37 = vpack.c.bf16 %v1285_v15, %v1285_v15  ;;  %v1290_v38 = vmax.f32 %v1258_v34, 0.0  ;;  %v1220_v17 = vadd.f32 %v1930_v61, %v855_v35  ;;  %v847_v16 = vadd.f32 %v846_v63, %v2242_v21 }
 0x133   : > { %v1256_v39 = vadd.f32 %v2247_v26, %v1217_v36 }
 0x134   : > { %1446 = vst.msk [vmem:[%s2255_s4 + $0x64] sm:$0xf] %vm1420_vm2, %v1771_v37  ;;  %v1776_v1 = vpack.c.bf16 %v1290_v38, %v1290_v38  ;;  %v1259_v19 = vadd.f32 %v2247_v26, %v1220_v17  ;;  %v1218_v41 = vadd.f32 %v1177_v40, %v847_v16 }
 0x135   : > { %v1288_v4 = vmax.f32 %v1256_v39, 0.0 }
 0x136   : > { %1451 = vst.msk [vmem:[%s2255_s4 + $0x78] sm:$0xf] %vm1420_vm2, %v1776_v1  ;;  %v1291_v42 = vmax.f32 %v1259_v19, 0.0  ;;  %v1257_v43 = vadd.f32 %v2247_v26, %v1218_v41 }
 0x137   : > { %v1774_v44 = vpack.c.bf16 %v1288_v4, %v1288_v4 }
 0x138   : > { %v1777_v45 = vpack.c.bf16 %v1291_v42, %v1291_v42  ;;  %v1289_v18 = vmax.f32 %v1257_v43, 0.0 }
 0x139   : > { %1449 = vst.msk [vmem:[%s2255_s4 + $0x70] sm:$0xf] %vm1420_vm2, %v1774_v44 }
 0x13a   : > { %1452 = vst.msk [vmem:[%s2255_s4 + $0x7c] sm:$0xf] %vm1420_vm2, %v1777_v45  ;;  %v1775_v21 = vpack.c.bf16 %v1289_v18, %v1289_v18 }
 0x13c   : > { %1450 = vst.msk [vmem:[%s2255_s4 + $0x74] sm:$0xf] %vm1420_vm2, %v1775_v21 }
 0x13d PF: > { %s13_s14 = sadd.s32 1, %s2032_s14   ;;  %s2390_s12 = smov %s2028_s13 }
 0x13e   : > { %p10_p5 = scmp.ge.s32.totalorder %s13_s14, 4   ;;  %s2391_s13 = smov %s2393_s15 }
 0x140   :  { %12 = sbr.rel (!%p10_p5) target bundleno = 2 (0x2), region = 67 }

</bundles_post_ra>
